<compile_context>
chip_gen: v6e
topology: v6e:2x2x1
jax: 0.10.0
libtpu: 0.0.40
codegen_flags: <defaults>
</compile_context>

<pallas_src>
import functools
import math

import numpy as np
import jax
import jax.numpy as jnp
from jax import lax
from jax.experimental import pallas as pl
from jax.experimental.pallas import tpu as pltpu

KERNEL_SIZE = 5
SIGMA = 3.0


def _gaussian_1d(kernel_size=KERNEL_SIZE, sigma=SIGMA):
    """1-D factor of the module's 2-D Gaussian: w2d[i, j] == w1[i] * w1[j]."""
    mean = (kernel_size - 1) / 2.0
    u = np.exp(-((np.arange(kernel_size) - mean) ** 2) / (2.0 * sigma ** 2))
    w = u / u.sum()
    return tuple(float(v) for v in w)


def _tap_sum(slices, w):
    """Weighted sum of shifted slices; symmetric taps share one multiply."""
    K = len(w)
    acc = None
    lo, hi = 0, K - 1
    while lo < hi:
        if abs(w[lo] - w[hi]) < 1e-12:
            term = w[lo] * (slices[lo] + slices[hi])
        else:
            term = w[lo] * slices[lo] + w[hi] * slices[hi]
        acc = term if acc is None else acc + term
        lo += 1
        hi -= 1
    if lo == hi:
        term = w[lo] * slices[lo]
        acc = term if acc is None else acc + term
    return acc


def _blur_kernel(x_ref, o_ref, xpad_ref, *, w1, pad):
    # x_ref:    (P, H, W)   input planes  (VMEM, auto-pipelined)
    # o_ref:    (P, H, W)   output planes
    # xpad_ref: (P, Hp, Wp) VMEM scratch, zero-padded copy of the input block
    P, H, W = o_ref.shape
    K = len(w1)

    # Build the zero-padded block in VMEM (no HBM-side jnp.pad).
    xpad_ref[...] = jnp.zeros_like(xpad_ref)
    xpad_ref[:, pad:pad + H, pad:pad + W] = x_ref[...].astype(jnp.float32)
    xp = xpad_ref[...]  # (P, Hp, Wp), f32

    # Separable Gaussian: horizontal (lane-axis) pass ...
    h = _tap_sum([xp[:, :, j:j + W] for j in range(K)], w1)    # (P, Hp, W)
    # ... then vertical (sublane-axis) pass.
    acc = _tap_sum([h[:, i:i + H, :] for i in range(K)], w1)   # (P, H, W)

    o_ref[...] = acc.astype(o_ref.dtype)


def _choose_p(n_planes, H, W, pad, vmem_budget_bytes=24 << 20):
    """Largest divisor of n_planes whose per-step working set fits the budget."""
    Hp, Wp = H + 2 * pad, W + 2 * pad
    # f32 bytes per plane: input block (double-buffered), output block
    # (double-buffered), padded scratch, horizontal intermediate, accumulator.
    per_plane = 4 * (2 * H * W + 2 * H * W + Hp * Wp + Hp * W + H * W)
    pmax = max(1, vmem_budget_bytes // per_plane)
    p = 1
    for d in range(1, n_planes + 1):
        if n_planes % d == 0 and d <= pmax:
            p = d
    return p


def gaussian_blur(x, kernel_size=KERNEL_SIZE, sigma=SIGMA):
    """x: (B, C, H, W) -> blurred (B, C, H, W). Matches the PyTorch module."""
    B, C, H, W = x.shape
    pad = (kernel_size - 1) // 2
    Hp, Wp = H + 2 * pad, W + 2 * pad
    N = B * C

    w1 = _gaussian_1d(kernel_size, sigma)
    P = _choose_p(N, H, W, pad)

    xr = x.reshape(N, H, W)   # collapse batch x channel (free reshape)
    kernel = functools.partial(_blur_kernel, w1=w1, pad=pad)

    out = pl.pallas_call(
        kernel,
        out_shape=jax.ShapeDtypeStruct((N, H, W), x.dtype),
        grid=(N // P,),
        in_specs=[pl.BlockSpec((P, H, W), lambda n: (n, 0, 0))],
        out_specs=pl.BlockSpec((P, H, W), lambda n: (n, 0, 0)),
        scratch_shapes=[pltpu.VMEM((P, Hp, Wp), jnp.float32)],
        compiler_params=pltpu.CompilerParams(
            dimension_semantics=("parallel",),
            vmem_limit_bytes=32 << 20),
    )(xr)
    return out.reshape(B, C, H, W)


# ---------------------------------------------------------------------------
# Pure-JAX reference (mirrors the PyTorch module exactly) for validation.
# ---------------------------------------------------------------------------

def _gaussian_2d_f32(kernel_size=KERNEL_SIZE, sigma=SIGMA):
    x_coord = jnp.arange(kernel_size, dtype=jnp.float32)
    x_grid = jnp.tile(x_coord, (kernel_size,)).reshape(kernel_size, kernel_size)
    y_grid = x_grid.T
    mean = (kernel_size - 1) / 2.0
    variance = sigma ** 2.0
    g = (1.0 / (2.0 * math.pi * variance)) * jnp.exp(
        -((x_grid - mean) ** 2 + (y_grid - mean) ** 2) / (2.0 * variance))
    return (g / jnp.sum(g)).astype(jnp.float32)


def _reference(x, kernel_size=KERNEL_SIZE, sigma=SIGMA):
    B, C, H, W = x.shape
    pad = (kernel_size - 1) // 2
    w2d = _gaussian_2d_f32(kernel_size, sigma)
    rhs = jnp.broadcast_to(w2d, (C, 1, kernel_size, kernel_size))
    return lax.conv_general_dilated(
        x, rhs,
        window_strides=(1, 1),
        padding=((pad, pad), (pad, pad)),
        dimension_numbers=("NCHW", "OIHW", "NCHW"),
        feature_group_count=C,
    )


if __name__ == "__main__":
    key = jax.random.PRNGKey(0)
    # The module's get_gaussian_kernel defaults to channels=3 -> 3-channel NCHW input.
    x = jax.random.normal(key, (2, 3, 16, 16), dtype=jnp.float32)

    out = gaussian_blur(x)
    out = jax.block_until_ready(out)

    ref = _reference(x)
    assert out.shape == x.shape and out.dtype == x.dtype
    assert jnp.allclose(out, ref, atol=1e-5, rtol=1e-5), "mismatch vs reference conv"

    print("KERNEL_OK")
</pallas_src>

<mosaic_0001>
module attributes {stable_mosaic.version = 11 : i64} {
  func.func @_blur_kernel(%arg0: i32, %arg1: memref<6x16x16xf32, #tpu.memory_space<vmem>>, %arg2: memref<6x16x16xf32, #tpu.memory_space<vmem>>, %arg3: memref<6x20x20xf32, #tpu.memory_space<vmem>>) attributes {dimension_semantics = [#tpu.dimension_semantics<parallel>], iteration_bounds = array<i64: 1>, scalar_prefetch = 0 : i64, scratch_operands = 1 : i64, tpu.core_type = #tpu.core_type<tc>, window_params = [{transform_indices = @transform_0, window_bounds = array<i64: 6, 16, 16>}, {transform_indices = @transform_1, window_bounds = array<i64: 6, 16, 16>}]} {
    %cst = arith.constant 0.000000e+00 : f32
    %0 = vector.broadcast %cst : f32 to vector<6x20x20xf32>
    %c0 = arith.constant 0 : index
    %c0_0 = arith.constant 0 : index
    %c0_1 = arith.constant 0 : index
    %1 = vector.load %arg3[%c0, %c0_0, %c0_1] : memref<6x20x20xf32, #tpu.memory_space<vmem>>, vector<6x20x20xf32>
    tpu.vector_store %arg3[%c0, %c0_0, %c0_1], %0 {strides = array<i32>} : memref<6x20x20xf32, #tpu.memory_space<vmem>>, vector<6x20x20xf32>,
    %c0_2 = arith.constant 0 : index
    %c0_3 = arith.constant 0 : index
    %c0_4 = arith.constant 0 : index
    %2 = vector.load %arg1[%c0_2, %c0_3, %c0_4] : memref<6x16x16xf32, #tpu.memory_space<vmem>>, vector<6x16x16xf32>
    %c0_5 = arith.constant 0 : index
    %c2 = arith.constant 2 : index
    %c2_6 = arith.constant 2 : index
    %3 = vector.load %arg3[%c0_5, %c2, %c2_6] : memref<6x20x20xf32, #tpu.memory_space<vmem>>, vector<6x16x16xf32>
    tpu.vector_store %arg3[%c0_5, %c2, %c2_6], %2 {strides = array<i32>} : memref<6x20x20xf32, #tpu.memory_space<vmem>>, vector<6x16x16xf32>,
    %c0_7 = arith.constant 0 : index
    %c0_8 = arith.constant 0 : index
    %c0_9 = arith.constant 0 : index
    %4 = vector.load %arg3[%c0_7, %c0_8, %c0_9] : memref<6x20x20xf32, #tpu.memory_space<vmem>>, vector<6x20x20xf32>
    %5 = vector.extract_strided_slice %4 {offsets = [0, 0, 0], sizes = [6, 20, 16], strides = [1, 1, 1]} : vector<6x20x20xf32> to vector<6x20x16xf32>
    %6 = vector.extract_strided_slice %4 {offsets = [0, 0, 1], sizes = [6, 20, 16], strides = [1, 1, 1]} : vector<6x20x20xf32> to vector<6x20x16xf32>
    %7 = vector.extract_strided_slice %4 {offsets = [0, 0, 2], sizes = [6, 20, 16], strides = [1, 1, 1]} : vector<6x20x20xf32> to vector<6x20x16xf32>
    %8 = vector.extract_strided_slice %4 {offsets = [0, 0, 3], sizes = [6, 20, 16], strides = [1, 1, 1]} : vector<6x20x20xf32> to vector<6x20x16xf32>
    %9 = vector.extract_strided_slice %4 {offsets = [0, 0, 4], sizes = [6, 20, 16], strides = [1, 1, 1]} : vector<6x20x20xf32> to vector<6x20x16xf32>
    %10 = arith.addf %5, %9 : vector<6x20x16xf32>
    %cst_10 = arith.constant 0.178203255 : f32
    %11 = vector.broadcast %cst_10 : f32 to vector<6x20x16xf32>
    %12 = arith.mulf %11, %10 : vector<6x20x16xf32>
    %13 = arith.addf %6, %8 : vector<6x20x16xf32>
    %cst_11 = arith.constant 0.210522279 : f32
    %14 = vector.broadcast %cst_11 : f32 to vector<6x20x16xf32>
    %15 = arith.mulf %14, %13 : vector<6x20x16xf32>
    %16 = arith.addf %12, %15 : vector<6x20x16xf32>
    %cst_12 = arith.constant 0.222548932 : f32
    %17 = vector.broadcast %cst_12 : f32 to vector<6x20x16xf32>
    %18 = arith.mulf %17, %7 : vector<6x20x16xf32>
    %19 = arith.addf %16, %18 : vector<6x20x16xf32>
    %20 = vector.extract_strided_slice %19 {offsets = [0, 0, 0], sizes = [6, 16, 16], strides = [1, 1, 1]} : vector<6x20x16xf32> to vector<6x16x16xf32>
    %21 = vector.extract_strided_slice %19 {offsets = [0, 1, 0], sizes = [6, 16, 16], strides = [1, 1, 1]} : vector<6x20x16xf32> to vector<6x16x16xf32>
    %22 = vector.extract_strided_slice %19 {offsets = [0, 2, 0], sizes = [6, 16, 16], strides = [1, 1, 1]} : vector<6x20x16xf32> to vector<6x16x16xf32>
    %23 = vector.extract_strided_slice %19 {offsets = [0, 3, 0], sizes = [6, 16, 16], strides = [1, 1, 1]} : vector<6x20x16xf32> to vector<6x16x16xf32>
    %24 = vector.extract_strided_slice %19 {offsets = [0, 4, 0], sizes = [6, 16, 16], strides = [1, 1, 1]} : vector<6x20x16xf32> to vector<6x16x16xf32>
    %25 = arith.addf %20, %24 : vector<6x16x16xf32>
    %cst_13 = arith.constant 0.178203255 : f32
    %26 = vector.broadcast %cst_13 : f32 to vector<6x16x16xf32>
    %27 = arith.mulf %26, %25 : vector<6x16x16xf32>
    %28 = arith.addf %21, %23 : vector<6x16x16xf32>
    %cst_14 = arith.constant 0.210522279 : f32
    %29 = vector.broadcast %cst_14 : f32 to vector<6x16x16xf32>
    %30 = arith.mulf %29, %28 : vector<6x16x16xf32>
    %31 = arith.addf %27, %30 : vector<6x16x16xf32>
    %cst_15 = arith.constant 0.222548932 : f32
    %32 = vector.broadcast %cst_15 : f32 to vector<6x16x16xf32>
    %33 = arith.mulf %32, %22 : vector<6x16x16xf32>
    %34 = arith.addf %31, %33 : vector<6x16x16xf32>
    %c0_16 = arith.constant 0 : index
    %c0_17 = arith.constant 0 : index
    %c0_18 = arith.constant 0 : index
    %35 = vector.load %arg2[%c0_16, %c0_17, %c0_18] : memref<6x16x16xf32, #tpu.memory_space<vmem>>, vector<6x16x16xf32>
    tpu.vector_store %arg2[%c0_16, %c0_17, %c0_18], %34 {strides = array<i32>} : memref<6x16x16xf32, #tpu.memory_space<vmem>>, vector<6x16x16xf32>,
    return
  }
  func.func @transform_0(%arg0: i32) -> (i32, i32, i32) {
    %c0_i32 = arith.constant 0 : i32
    %c0_i32_0 = arith.constant 0 : i32
    %c0_i32_1 = arith.constant 0 : i32
    return %arg0, %c0_i32, %c0_i32_0 : i32, i32, i32
  }
  func.func @transform_1(%arg0: i32) -> (i32, i32, i32) {
    %c0_i32 = arith.constant 0 : i32
    %c0_i32_0 = arith.constant 0 : i32
    %c0_i32_1 = arith.constant 0 : i32
    return %arg0, %c0_i32, %c0_i32_0 : i32, i32, i32
  }
}

</mosaic_0001>

<bundles_post_ra>
// kernel: tpu_custom_call.1
= control target key start
LH: loop header
LB: loop body
LE: loop exit
PB: predicated region body
PF: predicated region fallthrough
CT: control target
= control target key end

     0   :  { %6 = vsyncpa [#allocation4], 0  ;;  %s1389_s0 = inlined_call_operand.hbm [shape: f32[6,16,16], index: 0, kind: input, shape index: {}]   ;;  %s1390_s1 = inlined_call_operand.hbm [shape: f32[6,16,16], index: 1, kind: output, shape index: {}]  }
   0x1   :  { %7 = vsyncpa [#allocation5], 0  ;;  %s946_s6 = smov [#allocation3]  }
   0x2   :  { %s13_s7 = sshll.u32 %s946_s6, 4  ;;  %s14_s7 = int_to_ptr.vmem [resolvable:$true] %s13_s7 }
   0x3   :  { %s910_s8 = scalar_lea.vmem %s14_s7, 1536  ;;  %p915_p1 = scmp.lt.s32.totalorder %s14_s7, %s14_s7 }
   0x4   :  { %p911_p0 = scmp.ne.s32.totalorder %s14_s7, %s910_s8  ;;  %p916_p2 = scmp.lt.s32.totalorder %s910_s8, %s910_s8 }
   0x6   :  { %p917_p3 = por %p916_p2, %p915_p1 }
   0x8   :  { %p918_p4 = pnand %p917_p3, %p911_p0 }
   0xa   :  { %921 = shalt.err (!%p918_p4)
}
   0xb   :  { %s947_s9 = smov 128   ;;  %s948_s10 = smov 8  }
   0xc   :  { %19 = dma.hbm_to_vmem [thread:$0]  %s1389_s0, 1536, %s14_s7, [#allocation4], %s947_s9, %s947_s9, %s948_s10  }
   0xd   :  { %942 = dma.done.wait [#allocation4], 1536  }
   0xe   :  { %943 = vsyncadd [#allocation4], 4294965760  ;;  %vm23_vm0 = vcmask 162816   ;;  %v949_v0 = vmov 0.0   ;;  %vm26_vm1 = vcmask 158720   ;;  %v43_v1 = vld [vmem:[#allocation3] sm:$0xff] }
   0xf   :  { %24 = vst.msk [vmem:[#allocation2] sm:$0xff] %vm23_vm0, %v949_v0  ;;  %25 = vst.msk [vmem:[#allocation2 + $0x8] sm:$0xff] %vm23_vm0, %v949_v0  ;;  %v45_v2 = vld [vmem:[#allocation3 + $0x10] sm:$0xff]  ;;  %s950_s0 = smov 2   ;;  %v44_v3 = vld [vmem:[#allocation3 + $0x8] sm:$0xff]  ;;  %vm103_vm2 = vcmask 146448  }
  0x10   :  { %28 = vst.msk [vmem:[#allocation2 + $0x18] sm:$0xff] %vm23_vm0, %v949_v0  ;;  %29 = vst.msk [vmem:[#allocation2 + $0x20] sm:$0xff] %vm23_vm0, %v949_v0  ;;  %67 = vrot.lane.b32.xlu0 %v43_v1, %s950_s0  ;;  %71 = vrot.lane.b32.xlu1 %v45_v2, %s950_s0  ;;  %v46_v4 = vld [vmem:[#allocation3 + $0x18] sm:$0xff]  ;;  %v48_v5 = vld [vmem:[#allocation3 + $0x28] sm:$0xff]  ;;  %s951_s13 = smov 124   ;;  %s952_s14 = smov 126  }
  0x11   :  { %31 = vst.msk [vmem:[#allocation2 + $0x30] sm:$0xff] %vm23_vm0, %v949_v0  ;;  %32 = vst.msk [vmem:[#allocation2 + $0x38] sm:$0xff] %vm23_vm0, %v949_v0  ;;  %v47_v6 = vld [vmem:[#allocation3 + $0x20] sm:$0xff]  ;;  %v50_v7 = vld [vmem:[#allocation3 + $0x38] sm:$0xff]  ;;  %s953_s15 = smov 127   ;;  %vm548_vm3 = vcmask 1043456  }
  0x12   :  { %34 = vst.msk [vmem:[#allocation2 + $0x48] sm:$0xff] %vm23_vm0, %v949_v0  ;;  %35 = vst.msk [vmem:[#allocation2 + $0x50] sm:$0xff] %vm23_vm0, %v949_v0  ;;  %v49_v8 = vld [vmem:[#allocation3 + $0x30] sm:$0xff]  ;;  %v52_v9 = vld [vmem:[#allocation3 + $0x48] sm:$0xff]  ;;  %vm615_vm4 = vcmask 1045504   ;;  %vm718_vm5 = vcmask 1046528  }
  0x13   :  { %37 = vst.msk [vmem:[#allocation2 + $0x60] sm:$0xff] %vm23_vm0, %v949_v0  ;;  %38 = vst.msk [vmem:[#allocation2 + $0x68] sm:$0xff] %vm23_vm0, %v949_v0  ;;  %v51_v10 = vld [vmem:[#allocation3 + $0x40] sm:$0xff]  ;;  %v54_v11 = vld [vmem:[#allocation3 + $0x58] sm:$0xff]  ;;  %vm863_vm6 = vcmask 130048   ;;  %s954_s16 = smov [#allocation6]  }
  0x14   :  { %40 = vst.msk [vmem:[#allocation2 + $0x78] sm:$0xff] %vm23_vm0, %v949_v0  ;;  %41 = vst.msk [vmem:[#allocation2 + $0x80] sm:$0xff] %vm23_vm0, %v949_v0  ;;  %69 = vrot.lane.b32.xlu0 %v44_v3, %s950_s0  ;;  %73 = vrot.lane.b32.xlu1 %v46_v4, %s950_s0  ;;  %v53_v12 = vld [vmem:[#allocation3 + $0x50] sm:$0xff]  ;;  %s881_s17 = sshll.u32 %s954_s16, 4  ;;  %s882_s17 = int_to_ptr.vmem [resolvable:$true] %s881_s17 }
  0x15   :  { %27 = vst.msk [vmem:[#allocation2 + $0x10] sm:$0xf] %vm26_vm1, %v949_v0  ;;  %30 = vst.msk [vmem:[#allocation2 + $0x28] sm:$0xf] %vm26_vm1, %v949_v0  ;;  %s922_s18 = scalar_lea.vmem %s882_s17, 1536  ;;  %p927_p6 = scmp.lt.s32.totalorder %s882_s17, %s882_s17 }
  0x16   :  { %33 = vst.msk [vmem:[#allocation2 + $0x40] sm:$0xf] %vm26_vm1, %v949_v0  ;;  %36 = vst.msk [vmem:[#allocation2 + $0x58] sm:$0xf] %vm26_vm1, %v949_v0  ;;  %p923_p5 = scmp.ne.s32.totalorder %s882_s17, %s922_s18  ;;  %p928_p7 = scmp.lt.s32.totalorder %s922_s18, %s922_s18 }
  0x17   :  { %39 = vst.msk [vmem:[#allocation2 + $0x70] sm:$0xf] %vm26_vm1, %v949_v0  ;;  %42 = vst.msk [vmem:[#allocation2 + $0x88] sm:$0xf] %vm26_vm1, %v949_v0 }
  0x18   :  { %77 = vrot.lane.b32.xlu1 %v48_v5, %s950_s0  ;;  %75 = vrot.lane.b32.xlu0 %v47_v6, %s950_s0  ;;  %p929_p8 = por %p928_p7, %p927_p6 }
  0x1a   :  { %p930_p9 = pnand %p929_p8, %p923_p5 }
  0x1c   :  { %81 = vrot.lane.b32.xlu1 %v50_v7, %s950_s0  ;;  %79 = vrot.lane.b32.xlu0 %v49_v8, %s950_s0 }
  0x20   :  { %85 = vrot.lane.b32.xlu1 %v52_v9, %s950_s0  ;;  %83 = vrot.lane.b32.xlu0 %v51_v10, %s950_s0 }
  0x24   :  { %89 = vrot.lane.b32.xlu1 %v54_v11, %s950_s0  ;;  %87 = vrot.lane.b32.xlu0 %v53_v12, %s950_s0 }
  0x82   :  { %v68_v13 = vpop.permute.xlu0 %67  ;;  %v72_v14 = vpop.permute.xlu1 %71 }
  0x83   :  { %104 = vst.msk [vmem:[#allocation2 + $0x2] sm:$0xff] %vm103_vm2, %v68_v13  ;;  %106 = vst.msk [vmem:[#allocation2 + $0x1a] sm:$0xff] %vm103_vm2, %v72_v14 }
  0x86   :  { %v70_v15 = vpop.permute.xlu0 %69  ;;  %v74_v16 = vpop.permute.xlu1 %73 }
  0x87   :  { %105 = vst.msk [vmem:[#allocation2 + $0xa] sm:$0xff] %vm103_vm2, %v70_v15  ;;  %107 = vst.msk [vmem:[#allocation2 + $0x22] sm:$0xff] %vm103_vm2, %v74_v16 }
  0x8a   :  { %v975_v17 = vld [vmem:[#allocation2] sm:$0xff]  ;;  %v78_v18 = vpop.permute.xlu1 %77  ;;  %v76_v19 = vpop.permute.xlu0 %75  ;;  %v997_v26 = vld [vmem:[#allocation2 + $0x18] sm:$0xff] }
  0x8b   :  { %152 = vrot.lane.b32.xlu0 %v975_v17, %s951_s13  ;;  %109 = vst.msk [vmem:[#allocation2 + $0x3a] sm:$0xff] %vm103_vm2, %v78_v18  ;;  %108 = vst.msk [vmem:[#allocation2 + $0x32] sm:$0xff] %vm103_vm2, %v76_v19  ;;  %v422_v43 = vmul.f32 0.22254893, %v975_v17  ;;  %v425_v46 = vmul.f32 0.22254893, %v997_v26 }
  0x8e   :  { %v981_v20 = vld [vmem:[#allocation2 + $0x8] sm:$0xff]  ;;  %v983_v21 = vld [vmem:[#allocation2 + $0x10] sm:$0xf]  ;;  %v82_v22 = vpop.permute.xlu1 %81  ;;  %v80_v23 = vpop.permute.xlu0 %79  ;;  %v1007_v30 = vld [vmem:[#allocation2 + $0x20] sm:$0xff] }
  0x8f   :  { %154 = vrot.lane.b32.xlu1 %v981_v20, %s951_s13  ;;  %156 = vrot.lane.b32.xlu0 %v983_v21, %s951_s13  ;;  %111 = vst.msk [vmem:[#allocation2 + $0x52] sm:$0xff] %vm103_vm2, %v82_v22  ;;  %110 = vst.msk [vmem:[#allocation2 + $0x4a] sm:$0xff] %vm103_vm2, %v80_v23  ;;  %v1005_v29 = vld [vmem:[#allocation2 + $0x28] sm:$0xf]  ;;  %v423_v44 = vmul.f32 0.22254893, %v981_v20 }
  0x90   :  { %v424_v45 = vmul.f32 0.22254893, %v983_v21  ;;  %v426_v47 = vmul.f32 0.22254893, %v1007_v30  ;;  %v427_v48 = vmul.f32 0.22254893, %v1005_v29 }
  0x92   :  { %v86_v24 = vpop.permute.xlu1 %85  ;;  %v84_v25 = vpop.permute.xlu0 %83  ;;  %v1013_v31 = vld [vmem:[#allocation2 + $0x30] sm:$0xff]  ;;  %v1015_v32 = vld [vmem:[#allocation2 + $0x38] sm:$0xff]  ;;  %v1023_v34 = vld [vmem:[#allocation2 + $0x40] sm:$0xf] }
  0x93   :  { %242 = vrot.lane.b32.xlu1 %v975_v17, %s952_s14  ;;  %244 = vrot.lane.b32.xlu0 %v981_v20, %s952_s14  ;;  %113 = vst.msk [vmem:[#allocation2 + $0x6a] sm:$0xff] %vm103_vm2, %v86_v24  ;;  %112 = vst.msk [vmem:[#allocation2 + $0x62] sm:$0xff] %vm103_vm2, %v84_v25  ;;  %v428_v49 = vmul.f32 0.22254893, %v1013_v31  ;;  %v429_v50 = vmul.f32 0.22254893, %v1015_v32 }
  0x94   :  { %v430_v51 = vmul.f32 0.22254893, %v1023_v34 }
  0x96   :  { %v90_v27 = vpop.permute.xlu1 %89  ;;  %v88_v28 = vpop.permute.xlu0 %87  ;;  %v1021_v33 = vld [vmem:[#allocation2 + $0x48] sm:$0xff]  ;;  %v1029_v35 = vld [vmem:[#allocation2 + $0x58] sm:$0xf]  ;;  %v1031_v36 = vld [vmem:[#allocation2 + $0x50] sm:$0xff] }
  0x97   :  { %246 = vrot.lane.b32.xlu1 %v983_v21, %s952_s14  ;;  %248 = vrot.lane.b32.xlu0 %v997_v26, %s952_s14  ;;  %115 = vst.msk [vmem:[#allocation2 + $0x82] sm:$0xff] %vm103_vm2, %v90_v27  ;;  %114 = vst.msk [vmem:[#allocation2 + $0x7a] sm:$0xff] %vm103_vm2, %v88_v28  ;;  %v431_v52 = vmul.f32 0.22254893, %v1021_v33  ;;  %v432_v53 = vmul.f32 0.22254893, %v1031_v36 }
  0x98   :  { %v433_v54 = vmul.f32 0.22254893, %v1029_v35 }
  0x9a   :  { %v1037_v37 = vld [vmem:[#allocation2 + $0x60] sm:$0xff]  ;;  %v1039_v38 = vld [vmem:[#allocation2 + $0x68] sm:$0xff]  ;;  %v1047_v40 = vld [vmem:[#allocation2 + $0x70] sm:$0xf] }
  0x9b   :  { %250 = vrot.lane.b32.xlu1 %v1007_v30, %s952_s14  ;;  %252 = vrot.lane.b32.xlu0 %v1005_v29, %s952_s14  ;;  %v434_v55 = vmul.f32 0.22254893, %v1037_v37  ;;  %v435_v56 = vmul.f32 0.22254893, %v1039_v38  ;;  %v436_v57 = vmul.f32 0.22254893, %v1047_v40 }
  0x9e   :  { %v1045_v39 = vld [vmem:[#allocation2 + $0x78] sm:$0xff]  ;;  %v1053_v41 = vld [vmem:[#allocation2 + $0x88] sm:$0xf]  ;;  %v1055_v42 = vld [vmem:[#allocation2 + $0x80] sm:$0xff] }
  0x9f   :  { %254 = vrot.lane.b32.xlu1 %v1013_v31, %s952_s14  ;;  %256 = vrot.lane.b32.xlu0 %v1015_v32, %s952_s14  ;;  %v437_v58 = vmul.f32 0.22254893, %v1045_v39 }
  0xa3   :  { %258 = vrot.lane.b32.xlu1 %v1023_v34, %s952_s14  ;;  %260 = vrot.lane.b32.xlu0 %v1021_v33, %s952_s14 }
  0xa7   :  { %262 = vrot.lane.b32.xlu1 %v1031_v36, %s952_s14  ;;  %264 = vrot.lane.b32.xlu0 %v1029_v35, %s952_s14 }
  0xab   :  { %266 = vrot.lane.b32.xlu1 %v1037_v37, %s952_s14  ;;  %268 = vrot.lane.b32.xlu0 %v1039_v38, %s952_s14 }
  0xaf   :  { %270 = vrot.lane.b32.xlu1 %v1047_v40, %s952_s14  ;;  %272 = vrot.lane.b32.xlu0 %v1045_v39, %s952_s14 }
  0xb3   :  { %274 = vrot.lane.b32.xlu1 %v1055_v42, %s952_s14  ;;  %276 = vrot.lane.b32.xlu0 %v1053_v41, %s952_s14 }
  0xb7   :  { %158 = vrot.lane.b32.xlu1 %v997_v26, %s951_s13  ;;  %160 = vrot.lane.b32.xlu0 %v1007_v30, %s951_s13 }
  0xbb   :  { %162 = vrot.lane.b32.xlu1 %v1005_v29, %s951_s13  ;;  %164 = vrot.lane.b32.xlu0 %v1013_v31, %s951_s13 }
  0xbf   :  { %166 = vrot.lane.b32.xlu1 %v1015_v32, %s951_s13  ;;  %168 = vrot.lane.b32.xlu0 %v1023_v34, %s951_s13 }
  0xc3   :  { %170 = vrot.lane.b32.xlu1 %v1021_v33, %s951_s13  ;;  %172 = vrot.lane.b32.xlu0 %v1031_v36, %s951_s13 }
  0xc7   :  { %174 = vrot.lane.b32.xlu1 %v1029_v35, %s951_s13  ;;  %176 = vrot.lane.b32.xlu0 %v1037_v37, %s951_s13 }
  0xcb   :  { %178 = vrot.lane.b32.xlu1 %v1039_v38, %s951_s13  ;;  %180 = vrot.lane.b32.xlu0 %v1047_v40, %s951_s13 }
  0xcf   :  { %182 = vrot.lane.b32.xlu1 %v1045_v39, %s951_s13  ;;  %184 = vrot.lane.b32.xlu0 %v1055_v42, %s951_s13 }
  0xd3   :  { %186 = vrot.lane.b32.xlu1 %v1053_v41, %s951_s13  ;;  %458 = vrot.lane.b32.xlu0 %v422_v43, %s952_s14 }
  0xd7   :  { %460 = vrot.lane.b32.xlu1 %v423_v44, %s952_s14  ;;  %462 = vrot.lane.b32.xlu0 %v424_v45, %s952_s14 }
  0xdb   :  { %464 = vrot.lane.b32.xlu1 %v425_v46, %s952_s14  ;;  %466 = vrot.lane.b32.xlu0 %v426_v47, %s952_s14 }
  0xdf   :  { %468 = vrot.lane.b32.xlu1 %v427_v48, %s952_s14  ;;  %470 = vrot.lane.b32.xlu0 %v428_v49, %s952_s14 }
  0xe3   :  { %472 = vrot.lane.b32.xlu1 %v429_v50, %s952_s14  ;;  %474 = vrot.lane.b32.xlu0 %v430_v51, %s952_s14 }
  0xe7   :  { %476 = vrot.lane.b32.xlu1 %v431_v52, %s952_s14  ;;  %478 = vrot.lane.b32.xlu0 %v432_v53, %s952_s14 }
  0xeb   :  { %480 = vrot.lane.b32.xlu1 %v433_v54, %s952_s14  ;;  %482 = vrot.lane.b32.xlu0 %v434_v55, %s952_s14 }
  0xef   :  { %484 = vrot.lane.b32.xlu1 %v435_v56, %s952_s14  ;;  %486 = vrot.lane.b32.xlu0 %v436_v57, %s952_s14 }
  0xf3   :  { %488 = vrot.lane.b32.xlu1 %v437_v58, %s952_s14 }
  0xfd   :  { %v1123_v59 = vpop.permute.xlu0 %152 }
 0x101   :  { %v1125_v60 = vpop.permute.xlu1 %154  ;;  %v1127_v61 = vpop.permute.xlu0 %156 }
 0x105   :  { %v243_v62 = vpop.permute.xlu1 %242  ;;  %v245_v63 = vpop.permute.xlu0 %244 }
 0x106   :  { %v296_v0 = vadd.f32 %v243_v62, %v975_v17  ;;  %v297_v1 = vadd.f32 %v245_v63, %v981_v20 }
 0x108   :  { %v314_v2 = vmul.f32 0.21052228, %v296_v0  ;;  %v315_v3 = vmul.f32 0.21052228, %v297_v1 }
 0x109   :  { %v247_v4 = vpop.permute.xlu1 %246  ;;  %v249_v5 = vpop.permute.xlu0 %248 }
 0x10a   :  { %v298_v6 = vadd.f32 %v247_v4, %v983_v21  ;;  %v299_v7 = vadd.f32 %v249_v5, %v997_v26  ;;  %352 = vrot.lane.b32.xlu1 %v315_v3, %s953_s15  ;;  %350 = vrot.lane.b32.xlu0 %v314_v2, %s953_s15 }
 0x10c   :  { %v316_v8 = vmul.f32 0.21052228, %v298_v6  ;;  %v317_v9 = vmul.f32 0.21052228, %v299_v7 }
 0x10d   :  { %v251_v10 = vpop.permute.xlu1 %250  ;;  %v253_v11 = vpop.permute.xlu0 %252 }
 0x10e   :  { %v300_v12 = vadd.f32 %v251_v10, %v1007_v30  ;;  %v301_v13 = vadd.f32 %v253_v11, %v1005_v29  ;;  %356 = vrot.lane.b32.xlu1 %v317_v9, %s953_s15  ;;  %354 = vrot.lane.b32.xlu0 %v316_v8, %s953_s15  ;;  %v439_v11 = vmul.f32 0.22254893, %v1053_v41 }
 0x110   :  { %v318_v14 = vmul.f32 0.21052228, %v300_v12  ;;  %v319_v15 = vmul.f32 0.21052228, %v301_v13  ;;  %v438_v12 = vmul.f32 0.22254893, %v1055_v42 }
 0x111   :  { %v255_v16 = vpop.permute.xlu1 %254  ;;  %v257_v18 = vpop.permute.xlu0 %256 }
 0x112   :  { %v302_v19 = vadd.f32 %v255_v16, %v1013_v31  ;;  %v303_v22 = vadd.f32 %v257_v18, %v1015_v32  ;;  %360 = vrot.lane.b32.xlu1 %v319_v15, %s953_s15  ;;  %358 = vrot.lane.b32.xlu0 %v318_v14, %s953_s15 }
 0x114   :  { %v320_v23 = vmul.f32 0.21052228, %v302_v19  ;;  %v321_v24 = vmul.f32 0.21052228, %v303_v22 }
 0x115   :  { %v259_v25 = vpop.permute.xlu1 %258  ;;  %v261_v27 = vpop.permute.xlu0 %260 }
 0x116   :  { %v304_v28 = vadd.f32 %v259_v25, %v1023_v34  ;;  %v305_v43 = vadd.f32 %v261_v27, %v1021_v33  ;;  %364 = vrot.lane.b32.xlu1 %v321_v24, %s953_s15  ;;  %362 = vrot.lane.b32.xlu0 %v320_v23, %s953_s15 }
 0x118   :  { %v322_v44 = vmul.f32 0.21052228, %v304_v28  ;;  %v323_v45 = vmul.f32 0.21052228, %v305_v43 }
 0x119   :  { %v263_v46 = vpop.permute.xlu1 %262  ;;  %v265_v47 = vpop.permute.xlu0 %264 }
 0x11a   :  { %v306_v48 = vadd.f32 %v263_v46, %v1031_v36  ;;  %v307_v49 = vadd.f32 %v265_v47, %v1029_v35  ;;  %368 = vrot.lane.b32.xlu1 %v323_v45, %s953_s15  ;;  %366 = vrot.lane.b32.xlu0 %v322_v44, %s953_s15 }
 0x11c   :  { %v324_v50 = vmul.f32 0.21052228, %v306_v48  ;;  %v325_v51 = vmul.f32 0.21052228, %v307_v49 }
 0x11d   :  { %v267_v52 = vpop.permute.xlu1 %266  ;;  %v269_v53 = vpop.permute.xlu0 %268 }
 0x11e   :  { %v308_v54 = vadd.f32 %v267_v52, %v1037_v37  ;;  %v309_v55 = vadd.f32 %v269_v53, %v1039_v38  ;;  %372 = vrot.lane.b32.xlu1 %v325_v51, %s953_s15  ;;  %370 = vrot.lane.b32.xlu0 %v324_v50, %s953_s15 }
 0x120   :  { %v326_v56 = vmul.f32 0.21052228, %v308_v54  ;;  %v327_v57 = vmul.f32 0.21052228, %v309_v55 }
 0x121   :  { %v271_v58 = vpop.permute.xlu1 %270  ;;  %v273_v62 = vpop.permute.xlu0 %272 }
 0x122   :  { %v310_v63 = vadd.f32 %v271_v58, %v1047_v40  ;;  %v311_v0 = vadd.f32 %v273_v62, %v1045_v39  ;;  %376 = vrot.lane.b32.xlu1 %v327_v57, %s953_s15  ;;  %374 = vrot.lane.b32.xlu0 %v326_v56, %s953_s15  ;;  %v206_v58 = vadd.f32 %v1123_v59, %v975_v17 }
 0x123   :  { %v207_v62 = vadd.f32 %v1125_v60, %v981_v20 }
 0x124   :  { %v328_v1 = vmul.f32 0.21052228, %v310_v63  ;;  %v329_v2 = vmul.f32 0.21052228, %v311_v0  ;;  %v208_v63 = vadd.f32 %v1127_v61, %v983_v21 }
 0x125   :  { %v275_v3 = vpop.permute.xlu1 %274  ;;  %v277_v4 = vpop.permute.xlu0 %276  ;;  %v225_v59 = vmul.f32 0.17820325, %v207_v62 }
 0x126   :  { %v312_v5 = vadd.f32 %v275_v3, %v1055_v42  ;;  %v313_v6 = vadd.f32 %v277_v4, %v1053_v41  ;;  %380 = vrot.lane.b32.xlu1 %v329_v2, %s953_s15  ;;  %378 = vrot.lane.b32.xlu0 %v328_v1, %s953_s15  ;;  %v224_v3 = vmul.f32 0.17820325, %v206_v58  ;;  %v226_v21 = vmul.f32 0.17820325, %v208_v63 }
 0x128   :  { %v330_v7 = vmul.f32 0.21052228, %v312_v5  ;;  %v331_v8 = vmul.f32 0.21052228, %v313_v6 }
 0x129   :  { %v159_v9 = vpop.permute.xlu1 %158  ;;  %v161_v10 = vpop.permute.xlu0 %160 }
 0x12a   :  { %384 = vrot.lane.b32.xlu1 %v331_v8, %s953_s15  ;;  %382 = vrot.lane.b32.xlu0 %v330_v7, %s953_s15  ;;  %v209_v0 = vadd.f32 %v159_v9, %v997_v26  ;;  %v210_v4 = vadd.f32 %v161_v10, %v1007_v30 }
 0x12c   :  { %v227_v60 = vmul.f32 0.17820325, %v209_v0 }
 0x12d   :  { %v163_v13 = vpop.permute.xlu1 %162  ;;  %v165_v14 = vpop.permute.xlu0 %164 }
 0x12e   :  { %492 = vrot.lane.b32.xlu1 %v439_v11, %s952_s14  ;;  %490 = vrot.lane.b32.xlu0 %v438_v12, %s952_s14  ;;  %v211_v5 = vadd.f32 %v163_v13, %v1005_v29  ;;  %v212_v6 = vadd.f32 %v165_v14, %v1013_v31  ;;  %v228_v31 = vmul.f32 0.17820325, %v210_v4 }
 0x130   :  { %v229_v9 = vmul.f32 0.17820325, %v211_v5 }
 0x131   :  { %v167_v15 = vpop.permute.xlu1 %166  ;;  %v169_v16 = vpop.permute.xlu0 %168 }
 0x132   :  { %v213_v17 = vadd.f32 %v167_v15, %v1015_v32  ;;  %v214_v20 = vadd.f32 %v169_v16, %v1023_v34  ;;  %v1219_v34 = vmul.f32 0.17820325, %v212_v6 }
 0x134   :  { %v1221_v11 = vmul.f32 0.17820325, %v213_v17  ;;  %v1223_v12 = vmul.f32 0.17820325, %v214_v20 }
 0x135   :  { %v171_v18 = vpop.permute.xlu1 %170  ;;  %v173_v19 = vpop.permute.xlu0 %172 }
 0x136   :  { %v215_v26 = vadd.f32 %v171_v18, %v1021_v33  ;;  %v216_v61 = vadd.f32 %v173_v19, %v1031_v36 }
 0x138   :  { %v1225_v33 = vmul.f32 0.17820325, %v215_v26  ;;  %v1228_v14 = vmul.f32 0.17820325, %v216_v61 }
 0x139   :  { %v175_v22 = vpop.permute.xlu1 %174  ;;  %v177_v23 = vpop.permute.xlu0 %176 }
 0x13a   :  { %v217_v7 = vadd.f32 %v175_v22, %v1029_v35  ;;  %v218_v30 = vadd.f32 %v177_v23, %v1037_v37 }
 0x13c   :  { %v1230_v37 = vmul.f32 0.17820325, %v217_v7  ;;  %v1232_v15 = vmul.f32 0.17820325, %v218_v30 }
 0x13d   :  { %v179_v24 = vpop.permute.xlu1 %178  ;;  %v181_v25 = vpop.permute.xlu0 %180 }
 0x13e   :  { %v219_v36 = vadd.f32 %v179_v24, %v1039_v38  ;;  %v1235_v16 = vadd.f32 %v181_v25, %v1047_v40 }
 0x141   :  { %v1169_v27 = vpop.permute.xlu1 %182  ;;  %v1171_v28 = vpop.permute.xlu0 %184 }
 0x145   :  { %v1173_v43 = vpop.permute.xlu1 %186  ;;  %v459_v44 = vpop.permute.xlu0 %458 }
 0x149   :  { %v461_v45 = vpop.permute.xlu1 %460  ;;  %v1175_v46 = vpop.permute.xlu0 %462 }
 0x14d   :  { %v1177_v47 = vpop.permute.xlu1 %464  ;;  %v1179_v48 = vpop.permute.xlu0 %466 }
 0x151   :  { %v1181_v49 = vpop.permute.xlu1 %468  ;;  %v1183_v50 = vpop.permute.xlu0 %470 }
 0x155   :  { %v1185_v51 = vpop.permute.xlu1 %472  ;;  %v1187_v52 = vpop.permute.xlu0 %474 }
 0x159   :  { %v1189_v53 = vpop.permute.xlu1 %476  ;;  %v1191_v54 = vpop.permute.xlu0 %478 }
 0x15d   :  { %v1193_v55 = vpop.permute.xlu1 %480  ;;  %v1195_v56 = vpop.permute.xlu0 %482 }
 0x161   :  { %v1197_v57 = vpop.permute.xlu1 %484  ;;  %v1206_v1 = vpop.permute.xlu0 %486 }
 0x165   :  { %v1208_v2 = vpop.permute.xlu1 %488 }
 0x17c   :  { %v353_v29 = vpop.permute.xlu1 %352  ;;  %v351_v8 = vpop.permute.xlu0 %350 }
 0x17d   :  { %v405_v32 = vadd.f32 %v353_v29, %v225_v59  ;;  %v404_v10 = vadd.f32 %v351_v8, %v224_v3 }
 0x17f   :  { %v513_v13 = vadd.f32 %v461_v45, %v405_v32  ;;  %v512_v35 = vadd.f32 %v459_v44, %v404_v10  ;;  %v1237_v44 = vmul.f32 0.17820325, %v219_v36  ;;  %v1241_v45 = vadd.f32 %v1169_v27, %v1045_v39 }
 0x180   :  { %v357_v18 = vpop.permute.xlu1 %356  ;;  %v355_v19 = vpop.permute.xlu0 %354  ;;  %v1251_v39 = vadd.f32 %v1173_v43, %v1053_v41 }
 0x181   :  { %v550_v22 = vrot.slane %v513_v13, 4  ;;  %v617_v23 = vrot.slane %v513_v13, 2  ;;  %v774_v58 = vmul.f32 0.22254893, %v513_v13  ;;  %v549_v62 = vrot.slane %v512_v35, 4 }
 0x182   :  { %v616_v63 = vrot.slane %v512_v35, 2  ;;  %v773_v0 = vmul.f32 0.22254893, %v512_v35  ;;  %v407_v38 = vadd.f32 %v357_v18, %v227_v60  ;;  %v406_v24 = vadd.f32 %v355_v19, %v226_v21 }
 0x183   :  { %v810_v3 = vrot.slane %v774_v58, 2  ;;  %v551_v40 = vsel %vm548_vm3, %v549_v62, %v550_v22 }
 0x184   :  { %v591_v25 = vadd.f32 %v551_v40, %v512_v35  ;;  %v618_v4 = vsel %vm615_vm4, %v616_v63, %v617_v23  ;;  %v809_v5 = vrot.slane %v773_v0, 2  ;;  %v1246_v6 = vadd.f32 %v1177_v47, %v407_v38  ;;  %v361_v17 = vpop.permute.xlu1 %360  ;;  %v359_v20 = vpop.permute.xlu0 %358 }
 0x185   :  { %v664_v59 = vadd.f32 %v618_v4, %v512_v35  ;;  %v514_v21 = vadd.f32 %v1175_v46, %v406_v24  ;;  %v409_v26 = vadd.f32 %v361_v17, %v229_v9  ;;  %v408_v60 = vadd.f32 %v359_v20, %v228_v31 }
 0x186   :  { %v603_v27 = vmul.f32 0.17820325, %v591_v25  ;;  %v811_v61 = vsel %vm615_vm4, %v809_v5, %v810_v3  ;;  %v554_v7 = vrot.slane %v1246_v6, 4  ;;  %v776_v47 = vmul.f32 0.22254893, %v1246_v6 }
 0x187   :  { %v682_v30 = vmul.f32 0.21052228, %v664_v59  ;;  %v552_v29 = vrot.slane %v514_v21, 4  ;;  %v619_v8 = vrot.slane %v514_v21, 2  ;;  %v621_v32 = vrot.slane %v1246_v6, 2 }
 0x188   :  { %v775_v10 = vmul.f32 0.22254893, %v514_v21  ;;  %v517_v46 = vadd.f32 %v1181_v49, %v409_v26  ;;  %v516_v31 = vadd.f32 %v1179_v48, %v408_v60  ;;  %v365_v9 = vpop.permute.xlu1 %364  ;;  %v814_v43 = vrot.slane %v776_v47, 2  ;;  %v363_v40 = vpop.permute.xlu0 %362 }
 0x189   :  { %v719_v41 = vrot.slane %v682_v30, 1  ;;  %v553_v36 = vsel %vm548_vm3, %v550_v22, %v552_v29  ;;  %v620_v35 = vsel %vm615_vm4, %v617_v23, %v619_v8  ;;  %v666_v58 = vadd.f32 %v619_v8, %v514_v21 }
 0x18a   :  { %v592_v18 = vadd.f32 %v553_v36, %v513_v13  ;;  %v665_v19 = vadd.f32 %v620_v35, %v513_v13  ;;  %v812_v62 = vrot.slane %v775_v10, 2  ;;  %v557_v63 = vrot.slane %v517_v46, 4 }
 0x18b   :  { %v624_v0 = vrot.slane %v517_v46, 2  ;;  %v778_v38 = vmul.f32 0.22254893, %v517_v46  ;;  %v555_v24 = vrot.slane %v516_v31, 4  ;;  %v684_v48 = vmul.f32 0.21052228, %v666_v58 }
 0x18c   :  { %v604_v49 = vmul.f32 0.17820325, %v592_v18  ;;  %v683_v25 = vmul.f32 0.21052228, %v665_v19  ;;  %v813_v4 = vsel %vm615_vm4, %v810_v3, %v812_v62  ;;  %v369_v20 = vpop.permute.xlu1 %368  ;;  %v622_v30 = vrot.slane %v516_v31, 2  ;;  %v367_v19 = vpop.permute.xlu0 %366 }
 0x18d   :  { %v669_v5 = vadd.f32 %v624_v0, %v517_v46  ;;  %v817_v17 = vrot.slane %v778_v38, 2  ;;  %v556_v22 = vsel %vm548_vm3, %v554_v7, %v555_v24  ;;  %v558_v23 = vsel %vm548_vm3, %v555_v24, %v557_v63 }
 0x18e   :  { %v720_v13 = vrot.slane %v683_v25, 1  ;;  %v722_v59 = vrot.slane %v684_v48, 1  ;;  %v593_v21 = vadd.f32 %v556_v22, %v1246_v6  ;;  %v594_v26 = vadd.f32 %v558_v23, %v516_v31 }
 0x18f   :  { %v687_v60 = vmul.f32 0.21052228, %v669_v5  ;;  %v777_v47 = vmul.f32 0.22254893, %v516_v31  ;;  %v411_v29 = vadd.f32 %v365_v9, %v1221_v11  ;;  %v623_v18 = vsel %vm615_vm4, %v621_v32, %v622_v30 }
 0x190   :  { %v721_v8 = vsel %vm718_vm5, %v719_v41, %v720_v13  ;;  %v723_v3 = vsel %vm718_vm5, %v720_v13, %v722_v59  ;;  %v605_v10 = vmul.f32 0.17820325, %v593_v21  ;;  %v606_v46 = vmul.f32 0.17820325, %v594_v26  ;;  %v373_v25 = vpop.permute.xlu1 %372  ;;  %v371_v23 = vpop.permute.xlu0 %370 }
 0x191   :  { %v761_v7 = vadd.f32 %v721_v8, %v603_v27  ;;  %v762_v36 = vadd.f32 %v723_v3, %v604_v49  ;;  %v727_v35 = vrot.slane %v687_v60, 1  ;;  %v625_v58 = vsel %vm615_vm4, %v622_v30, %v624_v0 }
 0x192   :  { %v667_v62 = vadd.f32 %v623_v18, %v1246_v6  ;;  %v815_v63 = vrot.slane %v777_v47, 2  ;;  %v519_v38 = vadd.f32 %v1185_v51, %v411_v29  ;;  %v668_v41 = vadd.f32 %v625_v58, %v516_v31 }
 0x193   :  { %v851_v11 = vadd.f32 %v811_v61, %v761_v7  ;;  %v852_v9 = vadd.f32 %v813_v4, %v762_v36  ;;  %v410_v24 = vadd.f32 %v363_v40, %v1219_v34  ;;  %v413_v31 = vadd.f32 %v369_v20, %v1225_v33 }
 0x194   :  { %v685_v48 = vmul.f32 0.21052228, %v667_v62  ;;  %v816_v27 = vsel %vm615_vm4, %v814_v43, %v815_v63  ;;  %v818_v49 = vsel %vm615_vm4, %v815_v63, %v817_v17  ;;  %v560_v32 = vrot.slane %v519_v38, 4 }
 0x195   :  { %864 = vst.msk [vmem:[#allocation6] sm:$0xff] %vm863_vm6, %v851_v11  ;;  %865 = vst.msk [vmem:[#allocation6 + $0x8] sm:$0xff] %vm863_vm6, %v852_v9  ;;  %v686_v6 = vmul.f32 0.21052228, %v668_v41  ;;  %v627_v0 = vrot.slane %v519_v38, 2  ;;  %v518_v51 = vadd.f32 %v1183_v50, %v410_v24  ;;  %v412_v34 = vadd.f32 %v367_v19, %v1223_v12  ;;  %v377_v19 = vpop.permute.xlu1 %376 }
 0x196   :  { %v780_v5 = vmul.f32 0.22254893, %v519_v38  ;;  %v724_v61 = vrot.slane %v685_v48, 1  ;;  %v415_v40 = vadd.f32 %v373_v25, %v1230_v37  ;;  %v1282_v59 = vadd.f32 %v1189_v53, %v413_v31 }
 0x197   :  { %v725_v43 = vrot.slane %v686_v6, 1  ;;  %v559_v17 = vrot.slane %v518_v51, 4  ;;  %v626_v22 = vrot.slane %v518_v51, 2  ;;  %v779_v13 = vmul.f32 0.22254893, %v518_v51 }
 0x198   :  { %v820_v4 = vrot.slane %v780_v5, 2  ;;  %v520_v21 = vadd.f32 %v1187_v52, %v412_v34  ;;  %v1286_v50 = vadd.f32 %v1193_v55, %v415_v40  ;;  %v238_v53 = vmul.f32 0.17820325, %v1235_v16 }
 0x199   :  { %v726_v33 = vsel %vm718_vm5, %v724_v61, %v725_v43  ;;  %v728_v12 = vsel %vm718_vm5, %v725_v43, %v727_v35  ;;  %v561_v37 = vsel %vm548_vm3, %v559_v17, %v560_v32  ;;  %v628_v20 = vsel %vm615_vm4, %v626_v22, %v627_v0  ;;  %v375_v35 = vpop.permute.xlu0 %374 }
 0x19a   :  { %v763_v26 = vadd.f32 %v726_v33, %v605_v10  ;;  %v764_v60 = vadd.f32 %v728_v12, %v606_v46  ;;  %v595_v30 = vadd.f32 %v561_v37, %v518_v51  ;;  %v670_v47 = vadd.f32 %v628_v20, %v518_v51 }
 0x19b   :  { %v1294_v29 = vmul.f32 0.17820325, %v1241_v45  ;;  %v1298_v52 = vadd.f32 %v1171_v28, %v1055_v42  ;;  %v819_v55 = vrot.slane %v779_v13, 2  ;;  %v1301_v8 = vmul.f32 0.17820325, %v1251_v39 }
 0x19c   :  { %v853_v3 = vadd.f32 %v816_v27, %v763_v26  ;;  %v854_v7 = vadd.f32 %v818_v49, %v764_v60  ;;  %v564_v10 = vrot.slane %v1282_v59, 4  ;;  %v1306_v36 = vmul.f32 0.22254893, %v1282_v59 }
 0x19d   :  { %v821_v46 = vsel %vm615_vm4, %v819_v55, %v820_v4  ;;  %v562_v16 = vrot.slane %v520_v21, 4  ;;  %v629_v45 = vrot.slane %v520_v21, 2  ;;  %v688_v42 = vmul.f32 0.21052228, %v670_v47  ;;  %v379_v40 = vpop.permute.xlu0 %378 }
 0x19e   :  { %866 = vst.msk [vmem:[#allocation6 + $0x10] sm:$0xff] %vm863_vm6, %v853_v3  ;;  %867 = vst.msk [vmem:[#allocation6 + $0x18] sm:$0xff] %vm863_vm6, %v854_v7  ;;  %v631_v28 = vrot.slane %v1282_v59, 2  ;;  %v781_v39 = vmul.f32 0.22254893, %v520_v21  ;;  %v634_v18 = vrot.slane %v1286_v50, 2  ;;  %v414_v49 = vadd.f32 %v371_v23, %v1228_v14 }
 0x19f   :  { %v563_v58 = vsel %vm548_vm3, %v560_v32, %v562_v16  ;;  %v630_v62 = vsel %vm615_vm4, %v627_v0, %v629_v45  ;;  %v672_v63 = vadd.f32 %v629_v45, %v520_v21  ;;  %v784_v11 = vmul.f32 0.22254893, %v1286_v50 }
 0x1a0   :  { %v596_v9 = vadd.f32 %v563_v58, %v519_v38  ;;  %v671_v41 = vadd.f32 %v630_v62, %v519_v38  ;;  %v822_v24 = vrot.slane %v781_v39, 2  ;;  %v675_v25 = vadd.f32 %v634_v18, %v1286_v50 }
 0x1a1   :  { %v607_v48 = vmul.f32 0.17820325, %v595_v30  ;;  %v690_v27 = vmul.f32 0.21052228, %v672_v63  ;;  %v417_v6 = vadd.f32 %v377_v19, %v1237_v44  ;;  %v824_v5 = vrot.slane %v1306_v36, 2 }
 0x1a2   :  { %v689_v51 = vmul.f32 0.21052228, %v671_v41  ;;  %v823_v32 = vsel %vm615_vm4, %v820_v4, %v822_v24  ;;  %v693_v0 = vmul.f32 0.21052228, %v675_v25  ;;  %v729_v61 = vrot.slane %v688_v42, 1 }
 0x1a3   :  { %v732_v31 = vrot.slane %v690_v27, 1  ;;  %v567_v34 = vrot.slane %v1286_v50, 4  ;;  %v522_v38 = vadd.f32 %v1191_v54, %v414_v49  ;;  %v608_v43 = vmul.f32 0.17820325, %v596_v9  ;;  %v381_v50 = vpop.permute.xlu1 %380  ;;  %v383_v49 = vpop.permute.xlu0 %382 }
 0x1a4   :  { %v730_v17 = vrot.slane %v689_v51, 1  ;;  %v827_v22 = vrot.slane %v784_v11, 2  ;;  %v1323_v14 = vadd.f32 %v1197_v57, %v417_v6  ;;  %v737_v44 = vrot.slane %v693_v0, 1 }
 0x1a5   :  { %v565_v23 = vrot.slane %v522_v38, 4  ;;  %v632_v13 = vrot.slane %v522_v38, 2  ;;  %v416_v21 = vadd.f32 %v375_v35, %v1232_v15  ;;  %v783_v12 = vmul.f32 0.22254893, %v522_v38 }
 0x1a6   :  { %v731_v4 = vsel %vm718_vm5, %v729_v61, %v730_v17  ;;  %v733_v33 = vsel %vm718_vm5, %v730_v17, %v732_v31  ;;  %v418_v37 = vadd.f32 %v379_v40, %v238_v53  ;;  %v570_v53 = vrot.slane %v1323_v14, 4 }
 0x1a7   :  { %v765_v54 = vadd.f32 %v731_v4, %v607_v48  ;;  %v766_v20 = vadd.f32 %v733_v33, %v608_v43  ;;  %v566_v26 = vsel %vm548_vm3, %v564_v10, %v565_v23  ;;  %v568_v60 = vsel %vm548_vm3, %v565_v23, %v567_v34  ;;  %v385_v58 = vpop.permute.xlu1 %384 }
 0x1a8   :  { %v597_v57 = vadd.f32 %v566_v26, %v1282_v59  ;;  %v598_v30 = vadd.f32 %v568_v60, %v522_v38  ;;  %v633_v47 = vsel %vm615_vm4, %v631_v28, %v632_v13  ;;  %v635_v15 = vsel %vm615_vm4, %v632_v13, %v634_v18 }
 0x1a9   :  { %v855_v55 = vadd.f32 %v821_v46, %v765_v54  ;;  %v856_v3 = vadd.f32 %v823_v32, %v766_v20  ;;  %v673_v7 = vadd.f32 %v633_v47, %v1282_v59  ;;  %v674_v36 = vadd.f32 %v635_v15, %v522_v38  ;;  %v491_v54 = vpop.permute.xlu0 %490 }
 0x1aa   :  { %v825_v16 = vrot.slane %v783_v12, 2  ;;  %v1336_v45 = vmul.f32 0.22254893, %v1323_v14  ;;  %v419_v10 = vadd.f32 %v381_v50, %v1294_v29  ;;  %v637_v46 = vrot.slane %v1323_v14, 2 }
 0x1ab   :  { %868 = vst.msk [vmem:[#allocation6 + $0x20] sm:$0xff] %vm863_vm6, %v855_v55  ;;  %869 = vst.msk [vmem:[#allocation6 + $0x28] sm:$0xff] %vm863_vm6, %v856_v3  ;;  %v691_v35 = vmul.f32 0.21052228, %v673_v7  ;;  %v692_v42 = vmul.f32 0.21052228, %v674_v36  ;;  %v524_v28 = vadd.f32 %v1195_v56, %v416_v21  ;;  %v526_v19 = vadd.f32 %v1206_v1, %v418_v37  ;;  %v493_v17 = vpop.permute.xlu1 %492 }
 0x1ac   :  { %v609_v59 = vmul.f32 0.17820325, %v597_v57  ;;  %v826_v39 = vsel %vm615_vm4, %v824_v5, %v825_v16  ;;  %v828_v18 = vsel %vm615_vm4, %v825_v16, %v827_v22  ;;  %v610_v9 = vmul.f32 0.17820325, %v598_v30 }
 0x1ad   :  { %v734_v62 = vrot.slane %v691_v35, 1  ;;  %v735_v29 = vrot.slane %v692_v42, 1  ;;  %v569_v63 = vrot.slane %v524_v28, 4  ;;  %v636_v11 = vrot.slane %v524_v28, 2 }
 0x1ae   :  { %v830_v41 = vrot.slane %v1336_v45, 2  ;;  %v785_v24 = vmul.f32 0.22254893, %v524_v28  ;;  %v1348_v25 = vadd.f32 %v1208_v2, %v419_v10  ;;  %v572_v61 = vrot.slane %v526_v19, 4 }
 0x1af   :  { %v736_v56 = vsel %vm718_vm5, %v734_v62, %v735_v29  ;;  %v738_v48 = vsel %vm718_vm5, %v735_v29, %v737_v44  ;;  %v571_v27 = vsel %vm548_vm3, %v569_v63, %v570_v53  ;;  %v638_v1 = vsel %vm615_vm4, %v636_v11, %v637_v46 }
 0x1b0   :  { %v767_v6 = vadd.f32 %v736_v56, %v609_v59  ;;  %v768_v5 = vadd.f32 %v738_v48, %v610_v9  ;;  %v599_v51 = vadd.f32 %v571_v27, %v524_v28  ;;  %v676_v32 = vadd.f32 %v638_v1, %v524_v28 }
 0x1b1   :  { %v829_v0 = vrot.slane %v785_v24, 2  ;;  %v639_v31 = vrot.slane %v526_v19, 2  ;;  %v421_v34 = vadd.f32 %v385_v58, %v1301_v8  ;;  %v788_v43 = vmul.f32 0.22254893, %v1348_v25 }
 0x1b2   :  { %v857_v2 = vadd.f32 %v826_v39, %v767_v6  ;;  %v858_v38 = vadd.f32 %v828_v18, %v768_v5  ;;  %v694_v40 = vmul.f32 0.21052228, %v676_v32  ;;  %v573_v44 = vsel %vm548_vm3, %v570_v53, %v572_v61 }
 0x1b3   :  { %v831_v22 = vsel %vm615_vm4, %v829_v0, %v830_v41  ;;  %v640_v23 = vsel %vm615_vm4, %v637_v46, %v639_v31  ;;  %v678_v13 = vadd.f32 %v639_v31, %v526_v19  ;;  %v240_v21 = vmul.f32 0.17820325, %v1298_v52 }
 0x1b4   :  { %870 = vst.msk [vmem:[#allocation6 + $0x30] sm:$0xff] %vm863_vm6, %v857_v2  ;;  %871 = vst.msk [vmem:[#allocation6 + $0x38] sm:$0xff] %vm863_vm6, %v858_v38  ;;  %v600_v8 = vadd.f32 %v573_v44, %v1323_v14  ;;  %v677_v4 = vadd.f32 %v640_v23, %v1323_v14  ;;  %v787_v33 = vmul.f32 0.22254893, %v526_v19  ;;  %v574_v12 = vrot.slane %v1348_v25, 4 }
 0x1b5   :  { %v696_v50 = vmul.f32 0.21052228, %v678_v13  ;;  %v529_v37 = vadd.f32 %v493_v17, %v421_v34  ;;  %v641_v20 = vrot.slane %v1348_v25, 2  ;;  %v420_v57 = vadd.f32 %v383_v49, %v240_v21 }
 0x1b6   :  { %v695_v26 = vmul.f32 0.21052228, %v677_v4  ;;  %v832_v60 = vrot.slane %v787_v33, 2  ;;  %v739_v52 = vrot.slane %v694_v40, 1  ;;  %v834_v30 = vrot.slane %v788_v43, 2 }
 0x1b7   :  { %v742_v47 = vrot.slane %v696_v50, 1  ;;  %v644_v15 = vrot.slane %v529_v37, 2  ;;  %v577_v7 = vrot.slane %v529_v37, 4  ;;  %v528_v14 = vadd.f32 %v491_v54, %v420_v57 }
 0x1b8   :  { %v740_v55 = vrot.slane %v695_v26, 1  ;;  %v833_v3 = vsel %vm615_vm4, %v830_v41, %v832_v60  ;;  %v611_v36 = vmul.f32 0.17820325, %v599_v51  ;;  %v612_v16 = vmul.f32 0.17820325, %v600_v8 }
 0x1b9   :  { %v681_v53 = vadd.f32 %v644_v15, %v529_v37  ;;  %v790_v45 = vmul.f32 0.22254893, %v529_v37  ;;  %v575_v42 = vrot.slane %v528_v14, 4  ;;  %v642_v46 = vrot.slane %v528_v14, 2 }
 0x1ba   :  { %v741_v10 = vsel %vm718_vm5, %v739_v52, %v740_v55  ;;  %v743_v35 = vsel %vm718_vm5, %v740_v55, %v742_v47  ;;  %v789_v18 = vmul.f32 0.22254893, %v528_v14 }
 0x1bb   :  { %v769_v28 = vadd.f32 %v741_v10, %v611_v36  ;;  %v770_v59 = vadd.f32 %v743_v35, %v612_v16  ;;  %v699_v39 = vmul.f32 0.21052228, %v681_v53  ;;  %v576_v19 = vsel %vm548_vm3, %v574_v12, %v575_v42 }
 0x1bc   :  { %v578_v58 = vsel %vm548_vm3, %v575_v42, %v577_v7  ;;  %v643_v62 = vsel %vm615_vm4, %v641_v20, %v642_v46  ;;  %v645_v29 = vsel %vm615_vm4, %v642_v46, %v644_v15  ;;  %v837_v9 = vrot.slane %v790_v45, 2 }
 0x1bd   :  { %v859_v63 = vadd.f32 %v831_v22, %v769_v28  ;;  %v860_v11 = vadd.f32 %v833_v3, %v770_v59  ;;  %v601_v41 = vadd.f32 %v576_v19, %v1348_v25  ;;  %v602_v24 = vadd.f32 %v578_v58, %v528_v14 }
 0x1be   :  { %v679_v56 = vadd.f32 %v643_v62, %v1348_v25  ;;  %v680_v48 = vadd.f32 %v645_v29, %v528_v14  ;;  %v835_v27 = vrot.slane %v789_v18, 2  ;;  %v747_v1 = vrot.slane %v699_v39, 1 }
 0x1bf   :  { %872 = vst.msk [vmem:[#allocation6 + $0x40] sm:$0xff] %vm863_vm6, %v859_v63  ;;  %873 = vst.msk [vmem:[#allocation6 + $0x48] sm:$0xff] %vm863_vm6, %v860_v11  ;;  %v613_v61 = vmul.f32 0.17820325, %v601_v41  ;;  %v614_v31 = vmul.f32 0.17820325, %v602_v24 }
 0x1c0   :  { %v697_v49 = vmul.f32 0.21052228, %v679_v56  ;;  %v698_v6 = vmul.f32 0.21052228, %v680_v48  ;;  %v836_v5 = vsel %vm615_vm4, %v834_v30, %v835_v27  ;;  %v838_v51 = vsel %vm615_vm4, %v835_v27, %v837_v9 }
 0x1c2   :  { %v744_v32 = vrot.slane %v697_v49, 1  ;;  %v745_v0 = vrot.slane %v698_v6, 1 }
 0x1c4   :  { %v746_v34 = vsel %vm718_vm5, %v744_v32, %v745_v0  ;;  %v748_v25 = vsel %vm718_vm5, %v745_v0, %v747_v1 }
 0x1c5   :  { %v771_v2 = vadd.f32 %v746_v34, %v613_v61  ;;  %v772_v38 = vadd.f32 %v748_v25, %v614_v31 }
 0x1c7   :  { %v861_v40 = vadd.f32 %v836_v5, %v771_v2  ;;  %v862_v43 = vadd.f32 %v838_v51, %v772_v38 }
 0x1c9   :  { %874 = vst.msk [vmem:[#allocation6 + $0x50] sm:$0xff] %vm863_vm6, %v861_v40  ;;  %875 = vst.msk [vmem:[#allocation6 + $0x58] sm:$0xff] %vm863_vm6, %v862_v43 }
 0x1ca   :  { %933 = shalt.err (!%p930_p9)
}
 0x1cb   :  { %887 = dma.vmem_to_hbm [thread:$0]  %s882_s17, 1536, %s1390_s1, [#allocation5], %s947_s9, %s947_s9, %s948_s10  }
 0x1cc   :  { %944 = dma.done.wait [#allocation5], 1536  }
 0x1cd   :  { %945 = vsyncadd [#allocation5], 4294965760 }
 0x1ce   :  { %891 = vsyncpa [#allocation4], 1 }
 0x1cf   :  { %892 = vsyncpa [#allocation5], 1 }

</bundles_post_ra>
